<compile_context>
chip_gen: v5e
topology: v5e:2x2
jax: 0.10.0
libtpu: 0.0.40
codegen_flags: <defaults>
</compile_context>

<pallas_src>
import functools
import math

import jax
import jax.numpy as jnp
from jax.experimental import pallas as pl
from jax.experimental.pallas import tpu as pltpu


_LANE = 128


def _vmem_budget_bytes():
    """Generation-aware VMEM budget for the streamed working set."""
    cap = None
    try:
        info = pltpu.get_tpu_info()
        cap = getattr(info, "vmem_capacity_bytes", None)
    except Exception:
        cap = None
    if not cap:
        cap = 64 * 1024 * 1024  # conservative fallback (v7x per-TC physical)
    # ~60% of physical VMEM, capped at 48 MiB: leaves headroom for compiler
    # internal scratch and the second pipeline buffer on every generation.
    return int(min(int(cap * 0.6), 48 * 1024 * 1024))


def _choose_tiles(B, C, HW, itemsize, budget):
    """Pick (batch tile, spatial tile)."""
    # Batch tile: full B when small (block == full dim satisfies the (8,128)
    # rule); otherwise 8, so n_b >= 2 whenever B >= 16 and both v7x
    # TensorCores get a unit of "parallel" work.
    t_b = B if B <= 8 else 8
    # Spatial tile: a single full-HW tile for small inputs (also handles HW
    # that is not a multiple of 128), else a lane-wide 128-multiple targeting
    # 1024 (measured streaming kernels reach ~85% of HBM roofline at >=512).
    t_hw = HW if HW <= 1024 else 1024

    def working_set(thw):
        x_block = t_b * C * thw * itemsize   # one streamed input block
        acc = 2 * t_b * C * 4                # two tiny f32 accumulators
        return 2 * x_block + acc             # input is double-buffered

    # Shrink the spatial tile (falling back to a 128-multiple) if over budget.
    while working_set(t_hw) > budget and t_hw > _LANE:
        t_hw = max(_LANE, ((t_hw // 2) // _LANE) * _LANE)
    return t_b, t_hw


def _channel_attention_kernel(x_ref, w1t_ref, w2t_ref, o_ref, sum_acc, max_acc,
                              *, hw_total, t_hw, t_b, needs_mask,
                              use_stacked_fc1):
    # x_ref: (t_b, C, t_hw)  w1t_ref: (C, C_r)  w2t_ref: (C_r, C)  o_ref: (t_b, C)
    # sum_acc / max_acc: (t_b, C) float32 scratch accumulators.
    k = pl.program_id(1)
    n_k = pl.num_programs(1)

    @pl.when(k == 0)
    def _init():
        sum_acc[...] = jnp.zeros_like(sum_acc)
        max_acc[...] = jnp.full_like(max_acc, -jnp.inf)

    x = x_ref[...].astype(jnp.float32)

    def _accumulate(masked):
        if masked:
            # Mask lanes past the true spatial extent (partial last tile).
            lane = k * t_hw + jax.lax.broadcasted_iota(jnp.int32, x.shape, 2)
            valid = lane < hw_total
            x_sum = jnp.where(valid, x, 0.0)
            x_max = jnp.where(valid, x, -jnp.inf)
        else:
            x_sum = x
            x_max = x
        # Per-tile cross-lane reduce (XLU) straight into the tiny accumulators;
        # hides under the streaming DMA and keeps VMEM/vst traffic minimal.
        sum_acc[...] += jnp.sum(x_sum, axis=-1)
        max_acc[...] = jnp.maximum(max_acc[...], jnp.max(x_max, axis=-1))

    if needs_mask:
        # Only the genuinely partial last tile pays for iota/compare/select.
        @pl.when(k < n_k - 1)
        def _steady():
            _accumulate(masked=False)

        @pl.when(k == n_k - 1)
        def _tail():
            _accumulate(masked=True)
    else:
        _accumulate(masked=False)

    @pl.when(k == n_k - 1)
    def _finalize():
        mean_desc = sum_acc[...] * (1.0 / hw_total)   # (t_b, C)
        max_desc = max_acc[...]                       # (t_b, C)
        w1t = w1t_ref[...]                            # (C, C_r), pre-transposed
        w2t = w2t_ref[...]                            # (C_r, C)

        # fc2 is linear, so fc2(relu(fc1(mean))) + fc2(relu(fc1(max)))
        #               == fc2(relu(fc1(mean)) + relu(fc1(max))).
        if use_stacked_fc1:
            # t_b % 8 == 0: sublane-aligned stack -> single fc1 matmul
            # (halves MXU weight pushes in the finalize step).
            stacked = jnp.concatenate([mean_desc, max_desc], axis=0)  # (2t_b, C)
            h = jnp.maximum(
                jnp.dot(stacked, w1t, preferred_element_type=jnp.float32), 0.0)
            h = h[:t_b] + h[t_b:]
        else:
            h = (jnp.maximum(jnp.dot(mean_desc, w1t,
                                     preferred_element_type=jnp.float32), 0.0)
                 + jnp.maximum(jnp.dot(max_desc, w1t,
                                       preferred_element_type=jnp.float32), 0.0))
        y = jnp.dot(h, w2t, preferred_element_type=jnp.float32)          # (t_b, C)
        # NOTE: if B % t_b != 0, the padded rows of the last batch block hold
        # garbage; they are discarded by the clipped output writeback.
        o_ref[...] = jax.nn.sigmoid(y).astype(o_ref.dtype)


def f_channel_attention(x, w1, w2, *, stream_dtype=None):
    """x: (B, C, H, W); w1: (C_r, C); w2: (C, C_r). Returns (B, C, 1, 1).

    stream_dtype: optional narrower dtype (e.g. jnp.bfloat16) used only for
    streaming x through HBM; accumulation stays float32 (changes bitwise
    numerics slightly, ~2x bandwidth win, most valuable on v5e).
    """
    B, C, H, W = x.shape
    C_r = w1.shape[0]
    HW = H * W
    orig_dtype = x.dtype

    x_flat = x.reshape(B, C, HW)
    if stream_dtype is not None and stream_dtype != x_flat.dtype:
        x_flat = x_flat.astype(stream_dtype)

    # Pre-transpose the weights once here -> no in-kernel .T / XLU relayout.
    w1_t = jnp.transpose(w1).astype(jnp.float32)   # (C, C_r)
    w2_t = jnp.transpose(w2).astype(jnp.float32)   # (C_r, C)

    itemsize = jnp.dtype(x_flat.dtype).itemsize
    budget = _vmem_budget_bytes()
    t_b, t_hw = _choose_tiles(B, C, HW, itemsize, budget)
    n_b = pl.cdiv(B, t_b)
    n_hw = pl.cdiv(HW, t_hw)
    needs_mask = (HW % t_hw) != 0
    use_stacked_fc1 = (t_b % 8 == 0)
    # NOTE: C < 8 (degenerate test configs) under-fills sublanes ~2x; typical
    # channel-attention C >= 64 is unaffected.

    kernel = functools.partial(
        _channel_attention_kernel,
        hw_total=HW, t_hw=t_hw, t_b=t_b,
        needs_mask=needs_mask, use_stacked_fc1=use_stacked_fc1)

    # Double-buffered input block + tiny f32 accumulators + weights + output.
    est_vmem = (2 * t_b * C * t_hw * itemsize
                + 2 * t_b * C * 4
                + 2 * 2 * C * C_r * 4
                + 2 * t_b * C * jnp.dtype(orig_dtype).itemsize)
    # Cap at 48 MiB so v7x (64 MiB physical per TC) keeps compiler headroom.
    vmem_limit = int(min(max(2 * est_vmem, 32 * 1024 * 1024), 48 * 1024 * 1024))

    cost = pl.CostEstimate(
        flops=2 * B * C * HW + 6 * B * C * C_r,
        transcendentals=B * C,
        bytes_accessed=(B * C * HW * itemsize + 2 * C * C_r * 4
                        + B * C * jnp.dtype(orig_dtype).itemsize))

    out = pl.pallas_call(
        kernel,
        out_shape=jax.ShapeDtypeStruct((B, C), orig_dtype),
        grid_spec=pltpu.PrefetchScalarGridSpec(
            num_scalar_prefetch=0,
            grid=(n_b, n_hw),
            in_specs=[
                pl.BlockSpec((t_b, C, t_hw), lambda b, k: (b, 0, k)),
                pl.BlockSpec((C, C_r), lambda b, k: (0, 0)),
                pl.BlockSpec((C_r, C), lambda b, k: (0, 0)),
            ],
            out_specs=pl.BlockSpec((t_b, C), lambda b, k: (b, 0)),
            scratch_shapes=[
                pltpu.VMEM((t_b, C), jnp.float32),   # running sum
                pltpu.VMEM((t_b, C), jnp.float32),   # running max
            ]),
        compiler_params=pltpu.CompilerParams(
            dimension_semantics=("parallel", "arbitrary"),
            vmem_limit_bytes=vmem_limit),
        cost_estimate=cost,
    )(x_flat, w1_t, w2_t)

    return out.reshape(B, C, 1, 1)


def _kaiming_uniform(key, shape, a=math.sqrt(5), dtype=jnp.float32):
    # torch.nn.init.kaiming_uniform_ with a=sqrt(5): bound = gain*sqrt(3/fan_in)
    fan_in = shape[1]
    gain = math.sqrt(2.0 / (1.0 + a * a))
    bound = gain * math.sqrt(3.0 / fan_in)
    return jax.random.uniform(key, shape, dtype=dtype, minval=-bound, maxval=bound)


def reference_forward(x, w1, w2):
    # Pure-JAX reference mirroring the PyTorch forward semantics.
    input_mean = jnp.mean(x, axis=(-2, -1))          # (B, C)
    input_max = jnp.max(x, axis=(-2, -1))            # (B, C)

    def mlp(v):
        h = jnp.maximum(v @ w1.T, 0.0)
        return h @ w2.T

    out = jax.nn.sigmoid(mlp(input_mean) + mlp(input_max))
    return out.reshape(x.shape[0], x.shape[1], 1, 1)


if __name__ == "__main__":
    key = jax.random.PRNGKey(0)
    k_x, k_w1, k_w2 = jax.random.split(key, 3)

    # 1) Primary config: small shapes consistent with the module.
    B, N_in, H, W = 2, 4, 16, 16
    ratio = 1
    C_r = N_in // ratio
    x = jax.random.normal(k_x, (B, N_in, H, W), dtype=jnp.float32)
    w1 = _kaiming_uniform(k_w1, (C_r, N_in))   # weight_fc1: (N_in//ratio, N_in)
    w2 = _kaiming_uniform(k_w2, (N_in, C_r))   # weight_fc2: (N_in, N_in//ratio)

    out = f_channel_attention(x, w1, w2)
    jax.block_until_ready(out)
    ref = reference_forward(x, w1, w2)
    assert out.shape == (B, N_in, 1, 1)
    assert jnp.allclose(out, ref, atol=1e-5, rtol=1e-5)

    # 2) Streaming path: multiple spatial tiles with a masked partial tail.
    k_x2, k_w12, k_w22 = jax.random.split(jax.random.PRNGKey(1), 3)
    B2, C2, H2, W2 = 3, 8, 40, 36              # HW = 1440 -> 1024 + partial 416
    C_r2 = C2 // 2
    x2 = jax.random.normal(k_x2, (B2, C2, H2, W2), dtype=jnp.float32)
    w12 = _kaiming_uniform(k_w12, (C_r2, C2))
    w22 = _kaiming_uniform(k_w22, (C2, C_r2))

    out2 = f_channel_attention(x2, w12, w22)
    jax.block_until_ready(out2)
    ref2 = reference_forward(x2, w12, w22)
    assert out2.shape == (B2, C2, 1, 1)
    assert jnp.allclose(out2, ref2, atol=1e-4, rtol=1e-4)

    # 3) HW not a multiple of 128 with a single full-HW tile (lane padding in
    #    the reduce, per the correctness concern).
    k_x3 = jax.random.PRNGKey(2)
    x3 = jax.random.normal(k_x3, (2, 4, 15, 15), dtype=jnp.float32)  # HW = 225
    out3 = f_channel_attention(x3, w1, w2)
    jax.block_until_ready(out3)
    ref3 = reference_forward(x3, w1, w2)
    assert jnp.allclose(out3, ref3, atol=1e-5, rtol=1e-5)

    # 4) Multiple batch tiles (n_b = 2, exercises the v7x-parallel axis and the
    #    sublane-aligned single-matmul fc1 path).
    k_x4 = jax.random.PRNGKey(3)
    x4 = jax.random.normal(k_x4, (16, 8, 16, 16), dtype=jnp.float32)
    out4 = f_channel_attention(x4, w12, w22)
    jax.block_until_ready(out4)
    ref4 = reference_forward(x4, w12, w22)
    assert out4.shape == (16, 8, 1, 1)
    assert jnp.allclose(out4, ref4, atol=1e-5, rtol=1e-5)

    # 5) Optional bf16 streaming path (f32 accumulation, looser tolerance).
    out5 = f_channel_attention(x2, w12, w22, stream_dtype=jnp.bfloat16)
    jax.block_until_ready(out5)
    assert jnp.allclose(out5, ref2, atol=5e-2, rtol=5e-2)

    print("KERNEL_OK")
</pallas_src>

<mosaic_0001>
module attributes {stable_mosaic.version = 11 : i64} {
  func.func @_channel_attention_kernel(%arg0: i32, %arg1: i32, %arg2: memref<2x4x256xf32, #tpu.memory_space<vmem>>, %arg3: memref<4x4xf32, #tpu.memory_space<vmem>>, %arg4: memref<4x4xf32, #tpu.memory_space<vmem>>, %arg5: memref<2x4xf32, #tpu.memory_space<vmem>>, %arg6: memref<2x4xf32, #tpu.memory_space<vmem>>, %arg7: memref<2x4xf32, #tpu.memory_space<vmem>>) attributes {dimension_semantics = [#tpu.dimension_semantics<parallel>, #tpu.dimension_semantics<arbitrary>], iteration_bounds = array<i64: 1, 1>, scalar_prefetch = 0 : i64, scratch_operands = 2 : i64, tpu.core_type = #tpu.core_type<tc>, window_params = [{transform_indices = @transform_0, window_bounds = array<i64: 2, 4, 256>}, {pipeline_mode = #tpu.pipeline_mode<synchronous>, transform_indices = @transform_1, window_bounds = array<i64: 4, 4>}, {pipeline_mode = #tpu.pipeline_mode<synchronous>, transform_indices = @transform_2, window_bounds = array<i64: 4, 4>}, {transform_indices = @transform_3, window_bounds = array<i64: 2, 4>}]} {
    %c0_i32 = arith.constant 0 : i32
    %0 = arith.cmpi eq, %arg1, %c0_i32 : i32
    %1 = arith.extui %0 : i1 to i32
    %c0_i32_0 = arith.constant 0 : i32
    %2 = arith.cmpi ne, %1, %c0_i32_0 : i32
    scf.if %2 {
      %cst_14 = arith.constant 0.000000e+00 : f32
      %15 = vector.broadcast %cst_14 : f32 to vector<2x4xf32>
      %c0_15 = arith.constant 0 : index
      %c0_16 = arith.constant 0 : index
      %16 = vector.load %arg6[%c0_15, %c0_16] : memref<2x4xf32, #tpu.memory_space<vmem>>, vector<2x4xf32>
      tpu.vector_store %arg6[%c0_15, %c0_16], %15 {strides = array<i32>} : memref<2x4xf32, #tpu.memory_space<vmem>>, vector<2x4xf32>,
      %cst_17 = arith.constant 0xFF800000 : f32
      %17 = vector.broadcast %cst_17 : f32 to vector<2x4xf32>
      %c0_18 = arith.constant 0 : index
      %c0_19 = arith.constant 0 : index
      %18 = vector.load %arg7[%c0_18, %c0_19] : memref<2x4xf32, #tpu.memory_space<vmem>>, vector<2x4xf32>
      tpu.vector_store %arg7[%c0_18, %c0_19], %17 {strides = array<i32>} : memref<2x4xf32, #tpu.memory_space<vmem>>, vector<2x4xf32>,
    } else {
    }
    %c0 = arith.constant 0 : index
    %c0_1 = arith.constant 0 : index
    %c0_2 = arith.constant 0 : index
    %3 = vector.load %arg2[%c0, %c0_1, %c0_2] : memref<2x4x256xf32, #tpu.memory_space<vmem>>, vector<2x4x256xf32>
    %c0_3 = arith.constant 0 : index
    %c0_4 = arith.constant 0 : index
    %4 = vector.load %arg6[%c0_3, %c0_4] : memref<2x4xf32, #tpu.memory_space<vmem>>, vector<2x4xf32>
    %cst = arith.constant dense<0.000000e+00> : vector<2x4xf32>
    %5 = vector.multi_reduction <add>, %3, %cst [2] : vector<2x4x256xf32> to vector<2x4xf32>
    %6 = arith.addf %4, %5 : vector<2x4xf32>
    %c0_5 = arith.constant 0 : index
    %c0_6 = arith.constant 0 : index
    %7 = vector.load %arg6[%c0_5, %c0_6] : memref<2x4xf32, #tpu.memory_space<vmem>>, vector<2x4xf32>
    tpu.vector_store %arg6[%c0_5, %c0_6], %6 {strides = array<i32>} : memref<2x4xf32, #tpu.memory_space<vmem>>, vector<2x4xf32>,
    %c0_7 = arith.constant 0 : index
    %c0_8 = arith.constant 0 : index
    %8 = vector.load %arg7[%c0_7, %c0_8] : memref<2x4xf32, #tpu.memory_space<vmem>>, vector<2x4xf32>
    %cst_9 = arith.constant dense<0xFF800000> : vector<2x4xf32>
    %9 = vector.multi_reduction <maximumf>, %3, %cst_9 [2] : vector<2x4x256xf32> to vector<2x4xf32>
    %10 = arith.maximumf %8, %9 : vector<2x4xf32>
    %c0_10 = arith.constant 0 : index
    %c0_11 = arith.constant 0 : index
    %11 = vector.load %arg7[%c0_10, %c0_11] : memref<2x4xf32, #tpu.memory_space<vmem>>, vector<2x4xf32>
    tpu.vector_store %arg7[%c0_10, %c0_11], %10 {strides = array<i32>} : memref<2x4xf32, #tpu.memory_space<vmem>>, vector<2x4xf32>,
    %c0_i32_12 = arith.constant 0 : i32
    %12 = arith.cmpi eq, %arg1, %c0_i32_12 : i32
    %13 = arith.extui %12 : i1 to i32
    %c0_i32_13 = arith.constant 0 : i32
    %14 = arith.cmpi ne, %13, %c0_i32_13 : i32
    scf.if %14 {
      %c0_14 = arith.constant 0 : index
      %c0_15 = arith.constant 0 : index
      %15 = vector.load %arg6[%c0_14, %c0_15] : memref<2x4xf32, #tpu.memory_space<vmem>>, vector<2x4xf32>
      %cst_16 = arith.constant 3.906250e-03 : f32
      %16 = vector.broadcast %cst_16 : f32 to vector<2x4xf32>
      %17 = arith.mulf %15, %16 : vector<2x4xf32>
      %c0_17 = arith.constant 0 : index
      %c0_18 = arith.constant 0 : index
      %18 = vector.load %arg7[%c0_17, %c0_18] : memref<2x4xf32, #tpu.memory_space<vmem>>, vector<2x4xf32>
      %c0_19 = arith.constant 0 : index
      %c0_20 = arith.constant 0 : index
      %19 = vector.load %arg3[%c0_19, %c0_20] : memref<4x4xf32, #tpu.memory_space<vmem>>, vector<4x4xf32>
      %c0_21 = arith.constant 0 : index
      %c0_22 = arith.constant 0 : index
      %20 = vector.load %arg4[%c0_21, %c0_22] : memref<4x4xf32, #tpu.memory_space<vmem>>, vector<4x4xf32>
      %cst_23 = arith.constant dense<0.000000e+00> : vector<2x4xf32>
      %21 = tpu.matmul %17, %19, %cst_23 {dimension_numbers = #tpu.dot_dimension_numbers<[1], [0], [0], [1], [0, 0, 1, 1], [], []>} : vector<2x4xf32>, vector<4x4xf32>, vector<2x4xf32> -> vector<2x4xf32>
      %cst_24 = arith.constant 0.000000e+00 : f32
      %22 = vector.broadcast %cst_24 : f32 to vector<2x4xf32>
      %23 = arith.maximumf %21, %22 : vector<2x4xf32>
      %cst_25 = arith.constant dense<0.000000e+00> : vector<2x4xf32>
      %24 = tpu.matmul %18, %19, %cst_25 {dimension_numbers = #tpu.dot_dimension_numbers<[1], [0], [0], [1], [0, 0, 1, 1], [], []>} : vector<2x4xf32>, vector<4x4xf32>, vector<2x4xf32> -> vector<2x4xf32>
      %cst_26 = arith.constant 0.000000e+00 : f32
      %25 = vector.broadcast %cst_26 : f32 to vector<2x4xf32>
      %26 = arith.maximumf %24, %25 : vector<2x4xf32>
      %27 = arith.addf %23, %26 : vector<2x4xf32>
      %cst_27 = arith.constant dense<0.000000e+00> : vector<2x4xf32>
      %28 = tpu.matmul %27, %20, %cst_27 {dimension_numbers = #tpu.dot_dimension_numbers<[1], [0], [0], [1], [0, 0, 1, 1], [], []>} : vector<2x4xf32>, vector<4x4xf32>, vector<2x4xf32> -> vector<2x4xf32>
      %29 = arith.negf %28 : vector<2x4xf32>
      %30 = math.exp %29 : vector<2x4xf32>
      %cst_28 = arith.constant 1.000000e+00 : f32
      %31 = vector.broadcast %cst_28 : f32 to vector<2x4xf32>
      %32 = arith.addf %31, %30 : vector<2x4xf32>
      %33 = arith.divf %31, %32 : vector<2x4xf32>
      %c0_29 = arith.constant 0 : index
      %c0_30 = arith.constant 0 : index
      %34 = vector.load %arg5[%c0_29, %c0_30] : memref<2x4xf32, #tpu.memory_space<vmem>>, vector<2x4xf32>
      tpu.vector_store %arg5[%c0_29, %c0_30], %33 {strides = array<i32>} : memref<2x4xf32, #tpu.memory_space<vmem>>, vector<2x4xf32>,
    } else {
    }
    return
  }
  func.func @transform_0(%arg0: i32, %arg1: i32) -> (i32, i32, i32) {
    %c0_i32 = arith.constant 0 : i32
    %c0_i32_0 = arith.constant 0 : i32
    return %arg0, %c0_i32, %arg1 : i32, i32, i32
  }
  func.func @transform_1(%arg0: i32, %arg1: i32) -> (i32, i32) {
    %c0_i32 = arith.constant 0 : i32
    %c0_i32_0 = arith.constant 0 : i32
    %c0_i32_1 = arith.constant 0 : i32
    return %c0_i32, %c0_i32_0 : i32, i32
  }
  func.func @transform_2(%arg0: i32, %arg1: i32) -> (i32, i32) {
    %c0_i32 = arith.constant 0 : i32
    %c0_i32_0 = arith.constant 0 : i32
    %c0_i32_1 = arith.constant 0 : i32
    return %c0_i32, %c0_i32_0 : i32, i32
  }
  func.func @transform_3(%arg0: i32, %arg1: i32) -> (i32, i32) {
    %c0_i32 = arith.constant 0 : i32
    %c0_i32_0 = arith.constant 0 : i32
    return %arg0, %c0_i32 : i32, i32
  }
}

</mosaic_0001>

<bundles_post_ra>
// kernel: tpu_custom_call.1
= control target key start
LH: loop header
LB: loop body
LE: loop exit
PB: predicated region body
PF: predicated region fallthrough
CT: control target
= control target key end

     0   :  { %8 = vsyncpa [#allocation5], 0  ;;  %s436_s0 = inlined_call_operand.hbm [shape: f32[2,4,256], index: 0, kind: input, shape index: {}]   ;;  %s437_s1 = inlined_call_operand.hbm [shape: f32[4,4], index: 1, kind: input, shape index: {}]   ;;  %s438_s2 = inlined_call_operand.hbm [shape: f32[4,4], index: 2, kind: input, shape index: {}]   ;;  %s439_s3 = inlined_call_operand.hbm [shape: f32[2,4], index: 3, kind: output, shape index: {}]  }
   0x1   :  { %9 = vsyncpa [#allocation8], 0  ;;  %s29_s14 = sshll.u32 %s437_s1, 4  ;;  %s30_s14 = int_to_ptr.hbm [resolvable:$true] %s29_s14 }
   0x2   :  { %10 = vsyncpa [#allocation6], 0  ;;  %s380_s15 = smov [#allocation7]   ;;  %s15_s19 = sshll.u32 %s436_s0, 4  ;;  %s16_s19 = int_to_ptr.hbm [resolvable:$true] %s15_s19 }
   0x3   :  { %s31_s16 = sshll.u32 %s380_s15, 4  ;;  %s381_s20 = smov [#allocation4]   ;;  %s32_s16 = int_to_ptr.vmem [resolvable:$true] %s31_s16 }
   0x4   :  { %34 = dma.hbm_to_vmem [thread:$0]  %s30_s14, 64, %s32_s16, [#allocation8]  }
   0x5   :  { %s17_s21 = sshll.u32 %s381_s20, 4  ;;  %s382_s22 = smov 128   ;;  %s18_s21 = int_to_ptr.vmem [resolvable:$true] %s17_s21 }
   0x6   :  { %s383_s23 = smov 8   ;;  %s40_s1 = sshll.u32 %s438_s2, 4  ;;  %s41_s1 = int_to_ptr.hbm [resolvable:$true] %s40_s1 }
   0x7   :  { %23 = dma.hbm_to_vmem [thread:$0]  %s16_s19, 256, %s18_s21, [#allocation5], %s382_s22, %s382_s22, %s383_s23  }
   0x8   :  { %s384_s26 = smov [#allocation9]  }
   0x9   :  { %s42_s27 = sshll.u32 %s384_s26, 4  ;;  %s43_s27 = int_to_ptr.vmem [resolvable:$true] %s42_s27 }
   0xa   :  { %45 = dma.hbm_to_vmem [thread:$0]  %s41_s1, 64, %s43_s27, [#allocation8]  }
   0xb   :  { %374 = dma.done.wait [#allocation5], 256  }
   0xc   :  { %375 = vsyncadd [#allocation5], 4294967040 }
   0xd   :  { %376 = dma.done.wait [#allocation8], 128  }
   0xe   :  { %377 = vsyncadd [#allocation8], 4294967168  ;;  %v65_v0 = vld [vmem:[#allocation4] sm:$0xff]  ;;  %v66_v1 = vld [vmem:[#allocation4 + $0x8] sm:$0xff]  ;;  %vm81_vm0 = vcmask 1043456   ;;  %vm62_vm1 = vcmask 25600   ;;  %v94_v26 = vlaneseq }
   0xf   :  { %70 = vst [vmem:[#allocation1] ss:$2 sm:$0xff] %v65_v0  ;;  %v385_v22 = vmov 0.0   ;;  %v386_v23 = vmov -inf   ;;  %v140_v24 = vld [vmem:[#allocation7] sm:$0xf] }
  0x10   :  { %74 = vst [vmem:[#allocation1 + $0x10] ss:$2 sm:$0xff] %v66_v1  ;;  %259 = vmatpush.msk.msra.mxu0 %vm81_vm0, %v140_v24  ;;  %261 = vmatpush.msk.msra.mxu1 %vm81_vm0, %v140_v24  ;;  %v95_v27 = vand.u32 127, %v94_v26  ;;  %vm98_vm2 = vcmask 1041409   ;;  %vm142_vm3 = vcmask 31744   ;;  %s387_s0 = smov [#allocation10]  }
  0x11   :  { %63 = vst.msk [vmem:[#allocation2] sm:$0x3] %vm62_vm1, %v385_v22  ;;  %v141_v44 = vld [vmem:[#allocation9] sm:$0xf]  ;;  %s246_s2 = sshll.u32 %s387_s0, 4  ;;  %s248_s30 = sshll.u32 %s439_s3, 4  ;;  %s247_s2 = int_to_ptr.vmem [resolvable:$true] %s246_s2  ;;  %s249_s30 = int_to_ptr.hbm [resolvable:$true] %s248_s30 }
  0x12   :  { %64 = vst.msk [vmem:[#allocation3] sm:$0x3] %vm62_vm1, %v386_v23  ;;  %263 = vmatpush.msk.msra.mxu2 %vm81_vm0, %v141_v44 }
  0x16   :  { %v71_v2 = vld.sshfl [vmem:[#allocation1] sm:$0xff pattern:$0x75316420]  ;;  %v72_v3 = vld.sshfl [vmem:[#allocation1 + $0x8] sm:$0xff pattern:$0x75316420] }
  0x17   :  { %v82_v4 = vsel %vm81_vm0, %v71_v2, 0.0  ;;  %v83_v5 = vsel %vm81_vm0, %v72_v3, 0.0  ;;  %105 = vst [vmem:[#allocation1] ss:$2 sm:$0xff] %v65_v0 }
  0x18   :  { %v84_v6 = vadd.f32 %v83_v5, %v82_v4  ;;  %v75_v7 = vld.sshfl [vmem:[#allocation1 + $0x10] sm:$0xff pattern:$0x75316420]  ;;  %v76_v8 = vld.sshfl [vmem:[#allocation1 + $0x18] sm:$0xff pattern:$0x75316420] }
  0x19   :  { %109 = vst [vmem:[#allocation1 + $0x10] ss:$2 sm:$0xff] %v66_v1  ;;  %v87_v9 = vsel %vm81_vm0, %v75_v7, 0.0  ;;  %v88_v10 = vsel %vm81_vm0, %v76_v8, 0.0  ;;  %v67_v31 = vld [vmem:[#allocation2] sm:$0x3] }
  0x1a   :  { %85 = vadd.xlane.f32.xlu0 %v84_v6  ;;  %v89_v13 = vadd.f32 %v88_v10, %v87_v9  ;;  %v104_v37 = vld [vmem:[#allocation3] sm:$0x3] }
  0x1e   :  { %v106_v11 = vld.sshfl [vmem:[#allocation1] sm:$0xff pattern:$0x75316420]  ;;  %v107_v12 = vld.sshfl [vmem:[#allocation1 + $0x8] sm:$0xff pattern:$0x75316420] }
  0x1f   :  { %v116_v14 = vsel %vm81_vm0, %v106_v11, -inf  ;;  %v117_v15 = vsel %vm81_vm0, %v107_v12, -inf }
  0x20   :  { %v118_v16 = vmax.f32 %v116_v14, %v117_v15  ;;  %v110_v17 = vld.sshfl [vmem:[#allocation1 + $0x10] sm:$0xff pattern:$0x75316420]  ;;  %v111_v18 = vld.sshfl [vmem:[#allocation1 + $0x18] sm:$0xff pattern:$0x75316420] }
  0x21   :  { %v121_v19 = vsel %vm81_vm0, %v110_v17, -inf  ;;  %v122_v20 = vsel %vm81_vm0, %v111_v18, -inf }
  0x22   :  { %119 = vmax.xlane.f32.xlu1 %v118_v16  ;;  %90 = vadd.xlane.f32.xlu0 %v89_v13  ;;  %v123_v21 = vmax.f32 %v121_v19, %v122_v20 }
  0x2a   :  { %124 = vmax.xlane.f32.xlu1 %v123_v21 }
  0x8d   :  { %v86_v25 = vpop.xlane.xlu0 %85 }
  0x8e   :  { %v96_v30 = vperm.slane %v86_v25, %v95_v27 }
  0x95   :  { %v120_v28 = vpop.xlane.xlu1 %119  ;;  %v91_v29 = vpop.xlane.xlu0 %90 }
  0x96   :  { %v97_v32 = vperm.slane %v91_v29, %v95_v27  ;;  %v128_v36 = vperm.slane %v120_v28, %v95_v27 }
  0x98   :  { %v99_v33 = vsel %vm98_vm2, %v97_v32, %v96_v30 }
  0x99   :  { %v101_v34 = vadd.f32 %v99_v33, %v67_v31 }
  0x9b   :  { %103 = vst.msk [vmem:[#allocation2] sm:$0x3] %vm62_vm1, %v101_v34 }
  0x9d   :  { %v125_v35 = vpop.xlane.xlu1 %124 }
  0x9e   :  { %v129_v38 = vperm.slane %v125_v35, %v95_v27 }
  0xa0   :  { %v130_v39 = vsel %vm98_vm2, %v129_v38, %v128_v36 }
  0xa1   :  { %v132_v40 = vmax.f32 %v104_v37, %v130_v39 }
  0xa2   :  { %v137_v41 = vld [vmem:[#allocation2] sm:$0x3] }
  0xa3   :  { %133 = vst.msk [vmem:[#allocation3] sm:$0x3] %vm62_vm1, %v132_v40  ;;  %v138_v42 = vmul.f32 0.00390625, %v137_v41 }
  0xa5   :  { %260 = vmatmul.msk.f32.vlgmr.msra.gmra.mxu0 %vm142_vm3, %v138_v42 }
  0xaa   :  { %v139_v43 = vld [vmem:[#allocation3] sm:$0x3] }
  0xab   :  { %262 = vmatmul.msk.f32.vlgmr.msra.gmra.mxu1 %vm142_vm3, %v139_v43 }
 0x122   :  { %v166_v45 = vpop.f32.mrf.mxu0 }
 0x123   :  { %v169_v47 = vmax.f32 %v166_v45, 0.0 }
 0x128   :  { %v190_v46 = vpop.f32.mrf.mxu1 }
 0x129   :  { %v193_v48 = vmax.f32 %v190_v46, 0.0 }
 0x12b   :  { %v194_v49 = vadd.f32 %v193_v48, %v169_v47 }
 0x12d   :  { %264 = vmatmul.msk.f32.vlgmr.msra.gmra.mxu2 %vm142_vm3, %v194_v49 }
 0x1b0   :  { %v218_v50 = vpop.f32.mrf.mxu2 }
 0x1b1   :  { %v265_v51 = vmul.f32 -1.442695, %v218_v50 }
 0x1b3   :  { %274 = vpow2.f32 %v265_v51 }
 0x1b9   :  { %v275_v52 = vpop.eup %274 }
 0x1ba   :  { %v224_v53 = vadd.f32 1.0, %v275_v52 }
 0x1bc   :  { %276 = vrcp.f32 %v224_v53  ;;  %v236_v57 = vand.u32 2147483648, %v224_v53  ;;  %v234_v59 = vand.u32 2147483647, %v224_v53  ;;  %vm230_vm5 = vweird.f32 %v224_v53 }
 0x1be   :  { %v237_v61 = vor.u32 1.1754944e-38, %v236_v57  ;;  %vm235_vm7 = vcmp.eq.f32.partialorder %v234_v59, 8.507059e+37 }
 0x1c2   :  { %v277_v54 = vpop.eup %276 }
 0x1c3   :  { %v226_v55 = vmul.f32 %v277_v54, %v224_v53  ;;  %vm231_vm4 = vweird.f32 %v277_v54 }
 0x1c4   :  { %vm232_vm6 = vmor %vm230_vm5, %vm231_vm4 }
 0x1c5   :  { %v227_v56 = vsub.f32 1.0, %v226_v55 }
 0x1c7   :  { %v228_v58 = vmul.f32 %v277_v54, %v227_v56 }
 0x1c9   :  { %v229_v60 = vadd.f32 %v277_v54, %v228_v58 }
 0x1cb   :  { %v233_v62 = vsel %vm232_vm6, %v277_v54, %v229_v60 }
 0x1cc   :  { %v238_v63 = vsel %vm235_vm7, %v237_v61, %v233_v62 }
 0x1cd   :  { %240 = vst.msk [vmem:[#allocation10] sm:$0x3] %vm62_vm1, %v238_v63 }
 0x1ce   :  { %251 = dma.vmem_to_hbm [thread:$0]  %s247_s2, 32, %s249_s30, [#allocation6]  }
 0x1cf   :  { %378 = dma.done.wait [#allocation6], 32  }
 0x1d0   :  { %379 = vsyncadd [#allocation6], 4294967264 }
 0x1d1   :  { %256 = vsyncpa [#allocation5], 1 }
 0x1d2   :  { %257 = vsyncpa [#allocation8], 1 }
 0x1d3   :  { %258 = vsyncpa [#allocation6], 1 }

</bundles_post_ra>
